<compile_context>
chip_gen: v7x
topology: tpu7x:2x2x1
jax: 0.10.0
libtpu: 0.0.40
codegen_flags: <defaults>
</compile_context>

<pallas_src>
import functools

import jax
import jax.numpy as jnp
import numpy as np
from jax import lax
from jax.experimental import pallas as pl
from jax.experimental.pallas import tpu as pltpu


def _attention_kernel(x_ref, ln_g_ref, ln_b_ref, wqkv_ref, wout_ref, bout_ref,
                      o_ref, *, bb, seq, heads, dim_head, eps, flat_out):
    """One grid step: `bb` batch elements (rows = bb*seq), full sequence."""
    inner = heads * dim_head
    rows = bb * seq
    d_model = x_ref.shape[-1]

    x = x_ref[...].astype(jnp.float32)                             # (rows, D)

    # ---- LayerNorm (f32, biased variance, eps=1e-5; matches nn.LayerNorm) ----
    mean = jnp.mean(x, axis=-1, keepdims=True)
    var = jnp.mean((x - mean) ** 2, axis=-1, keepdims=True)
    xn = (x - mean) * lax.rsqrt(var + eps)
    xn = xn * ln_g_ref[...] + ln_b_ref[...]                        # (rows, D)

    # ---- QKV projection: one row-dense matmul, bf16 operands, f32 accumulation.
    # (softmax scale is pre-folded into the Q columns of wqkv on the host)
    qkv = jnp.dot(xn.astype(jnp.bfloat16), wqkv_ref[...],
                  preferred_element_type=jnp.float32)              # (rows, 3*inner)
    # Split rows -> (bb, seq): pure major-dim split (layout-free when seq % 8 == 0).
    qkv = qkv.reshape(bb, seq, 3 * inner)

    # ---- Attention: batched over bb inside each einsum, short static head loop. ----
    # TODO(synk): full head-batching (two batch dims in one dot_general) is not used;
    #             heads remain a small static loop with bb batched per matmul.
    head_outs = []
    for h in range(heads):                                         # static, small
        c = h * dim_head
        q = qkv[:, :, c:c + dim_head].astype(jnp.bfloat16)                     # (bb,s,dh)
        k = qkv[:, :, inner + c:inner + c + dim_head].astype(jnp.bfloat16)     # (bb,s,dh)
        v = qkv[:, :, 2 * inner + c:2 * inner + c + dim_head].astype(jnp.bfloat16)

        # Scores: contract dh (no explicit k transpose), batch over bb.
        s = jnp.einsum("bqd,bkd->bqk", q, k,
                       preferred_element_type=jnp.float32)         # (bb, s, s)
        s = s - jnp.max(s, axis=-1, keepdims=True)                 # stable softmax
        e = jnp.exp(s)
        denom = jnp.sum(e, axis=-1, keepdims=True)                 # (bb, s, 1)
        # mask=None and dropout p=0 (inference) -> identity.

        # attn @ V with softmax normalization deferred to the small (s, dh) result.
        ov = jnp.einsum("bqk,bkd->bqd", e.astype(jnp.bfloat16), v,
                        preferred_element_type=jnp.float32)        # (bb, s, dh) f32
        ov = ov * pl.reciprocal(denom, approx=True)                # EUP slot
        head_outs.append(ov)

    # Fused head-concat + output projection: ONE matmul with K = inner (fills the
    # MXU depth; no per-head (seq, D) VALU accumulates).
    slab = jnp.concatenate(head_outs, axis=-1)                     # (bb, s, inner) f32
    slab = slab.reshape(rows, inner).astype(jnp.bfloat16)          # major-dim collapse
    out = jnp.dot(slab, wout_ref[...],
                  preferred_element_type=jnp.float32)              # (rows, D)
    out = out + bout_ref[...]                                      # (1, D) bias

    if flat_out:
        # Lane-dense store: (rows, D) -> (bb, seq*D) so stores are unmasked vst.
        o_ref[...] = out.reshape(bb, seq * d_model).astype(o_ref.dtype)
    else:
        o_ref[...] = out.astype(o_ref.dtype)


def _device_hints():
    """Best-effort chip hints: (multiple TensorCores per device, VMEM capacity)."""
    try:
        kind = jax.devices()[0].device_kind.lower()
    except Exception:  # pragma: no cover - defensive
        kind = ""
    single_tc = ("v5" in kind) or ("v6" in kind)      # v5e / v6e: one TC, 128 MiB VMEM
    if single_tc:
        return False, 128 * 1024 * 1024
    return True, 64 * 1024 * 1024                      # v7x-style: 2 TCs, 64 MiB VMEM


def _pick_batch_block(batch, seq, *, multi_tc):
    """Pick bb (a divisor of batch).

    Single-TC chips: grab the largest block that fits `target_rows` (grid is a
    serial loop; bigger blocks = bigger matmuls, fewer per-step overheads).
    Multi-TC chips: keep >= 2 grid steps (prefer an even count) so both cores work.
    """
    target_rows = 256 if multi_tc else 512
    cands = [bb for bb in range(1, batch + 1)
             if batch % bb == 0 and bb * seq <= target_rows]
    if not cands:
        return 1
    if multi_tc and batch >= 2:
        two = [bb for bb in cands if batch // bb >= 2]
        if two:
            even = [bb for bb in two if (batch // bb) % 2 == 0]
            return max(even) if even else max(two)
    return max(cands)


def attention_forward(x, ln_g, ln_b, wqkv, wout, bout, *, heads, dim_head,
                      batch_block=None):
    """Attention forward (mask=None, dropout p=0).

    x: (B, N, D); ln_g/ln_b: (1, D); wqkv: (D, 3*inner); wout: (inner, D); bout: (1, D).
    """
    B, N, D = x.shape
    inner = heads * dim_head
    scale = float(dim_head) ** -0.5

    multi_tc, vmem_cap = _device_hints()
    bb = batch_block if batch_block is not None else _pick_batch_block(
        B, N, multi_tc=multi_tc)
    assert B % bb == 0, "batch block must divide batch"
    rows = bb * N

    # Fold the softmax scale into the Q columns of wqkv; store matmul weights bf16.
    wqkv_k = (wqkv.astype(jnp.float32).at[:, :inner].multiply(scale)
              .astype(jnp.bfloat16))                               # (D, 3*inner)
    wout_k = wout.astype(jnp.bfloat16)                             # (inner, D)
    bout_k = bout.astype(jnp.float32).reshape(1, D)
    ln_g_k = ln_g.astype(jnp.float32).reshape(1, D)
    ln_b_k = ln_b.astype(jnp.float32).reshape(1, D)

    # Flatten the input host-side (free view) so the kernel works on (rows, D).
    x2 = x.reshape(B * N, D)

    # Lane-dense output path: only when D is not 128-aligned, N*D is, and the
    # block's sublane dim stays tile-legal (bb == B or a multiple of 8).
    flat_out = (D % 128 != 0) and ((N * D) % 128 == 0) and (bb == B or bb % 8 == 0)

    kernel = functools.partial(
        _attention_kernel, bb=bb, seq=N, heads=heads, dim_head=dim_head,
        eps=1e-5, flat_out=flat_out)

    if flat_out:
        out_shape = jax.ShapeDtypeStruct((B, N * D), x.dtype)
        out_spec = pl.BlockSpec((bb, N * D), lambda i: (i, 0))
    else:
        out_shape = jax.ShapeDtypeStruct((B * N, D), x.dtype)
        out_spec = pl.BlockSpec((rows, D), lambda i: (i, 0))

    # ---- VMEM budget: actual dtype sizes; weights counted double-buffered. ----
    # (Single-buffering the constant weight specs via pipeline_mode=pl.Buffered(1)
    #  would shave this further; kept default pipelining here.)
    itemsize = x.dtype.itemsize
    io_bytes = 2 * 2 * rows * D * itemsize                         # x + out blocks, 2-buffered
    weight_bytes = 2 * ((D * 3 * inner + inner * D) * 2 + 3 * D * 4)
    work_bytes = (rows * D * 4                                     # xn (f32)
                  + rows * 3 * inner * 4                           # qkv (f32)
                  + 2 * bb * N * N * 4                             # scores + exp (one head)
                  + rows * inner * 4                               # head slab
                  + rows * D * 4)                                  # f32 out
    vmem_limit = int(min(int(0.75 * vmem_cap),
                         max(8 * 1024 * 1024,
                             4 * (io_bytes + weight_bytes + work_bytes))))

    # Advisory cost estimate so XLA schedules around the custom call sensibly.
    flops = (2 * B * N * D * 3 * inner               # QKV projection
             + 2 * B * heads * N * N * dim_head * 2  # QK^T and attn @ V
             + 2 * B * N * inner * D)                # output projection
    transcendentals = B * heads * N * N + B * N      # exp + rsqrt
    bytes_accessed = (2 * B * N * D * itemsize
                      + (D * 3 * inner + inner * D) * 2
                      + 3 * D * 4)

    y = pl.pallas_call(
        kernel,
        out_shape=out_shape,
        grid_spec=pltpu.PrefetchScalarGridSpec(
            num_scalar_prefetch=0,
            grid=(B // bb,),
            in_specs=[
                pl.BlockSpec((rows, D), lambda i: (i, 0)),         # x row block
                pl.BlockSpec((1, D), lambda i: (0, 0)),            # LN gamma (resident)
                pl.BlockSpec((1, D), lambda i: (0, 0)),            # LN beta  (resident)
                pl.BlockSpec((D, 3 * inner), lambda i: (0, 0)),    # W_qkv bf16, scale folded
                pl.BlockSpec((inner, D), lambda i: (0, 0)),        # W_out bf16
                pl.BlockSpec((1, D), lambda i: (0, 0)),            # b_out
            ],
            out_specs=out_spec,
        ),
        compiler_params=pltpu.CompilerParams(
            dimension_semantics=("parallel",),
            vmem_limit_bytes=vmem_limit,
        ),
        cost_estimate=pl.CostEstimate(
            flops=int(flops),
            transcendentals=int(transcendentals),
            bytes_accessed=int(bytes_accessed),
        ),
    )(x2, ln_g_k, ln_b_k, wqkv_k, wout_k, bout_k)

    return y.reshape(B, N, D)


def _reference(x, ln_g, ln_b, wqkv, wout, bout, *, heads, dim_head):
    """Pure-JAX f32 reference mirroring the PyTorch forward (mask=None, dropout=0)."""
    x = x.astype(jnp.float32)
    mean = jnp.mean(x, axis=-1, keepdims=True)
    var = jnp.mean((x - mean) ** 2, axis=-1, keepdims=True)
    xn = (x - mean) / jnp.sqrt(var + 1e-5) * ln_g[0] + ln_b[0]
    qkv = xn @ wqkv                                       # (B, N, 3*inner)
    q, k, v = jnp.split(qkv, 3, axis=-1)

    def split_heads(t):                                   # 'b n (h d) -> b h n d'
        B, N, _ = t.shape
        return jnp.transpose(t.reshape(B, N, heads, dim_head), (0, 2, 1, 3))

    q, k, v = map(split_heads, (q, k, v))
    dots = jnp.einsum("bhnd,bhmd->bhnm", q, k) * (dim_head ** -0.5)
    attn = jax.nn.softmax(dots, axis=-1)
    out = jnp.einsum("bhnm,bhmd->bhnd", attn, v)          # (B, H, N, dh)
    B, H, N, dh = out.shape
    out = jnp.transpose(out, (0, 2, 1, 3)).reshape(B, N, H * dh)
    return out @ wout + bout[0]


if __name__ == "__main__":
    B, N, D = 2, 8, 32
    heads, dim_head = 4, 16
    inner = heads * dim_head

    key = jax.random.PRNGKey(0)
    kx, kq, ko, kb = jax.random.split(key, 4)

    x = jax.random.normal(kx, (B, N, D), dtype=jnp.float32)

    ln_g = jnp.ones((1, D), jnp.float32)
    ln_b = jnp.zeros((1, D), jnp.float32)
    # nn.Linear(dim, inner*3, bias=False): weight (3*inner, dim); store W.T -> (dim, 3*inner)
    wqkv = jax.random.normal(kq, (D, 3 * inner), jnp.float32) * 0.05
    # nn.Linear(inner, dim): weight (dim, inner); store W.T -> (inner, dim)
    wout = jax.random.normal(ko, (inner, D), jnp.float32) * 0.05
    bout = jax.random.normal(kb, (1, D), jnp.float32) * 0.05

    y = attention_forward(x, ln_g, ln_b, wqkv, wout, bout,
                          heads=heads, dim_head=dim_head)
    y = jax.block_until_ready(y)

    y_ref = _reference(x, ln_g, ln_b, wqkv, wout, bout,
                       heads=heads, dim_head=dim_head)
    # bf16 matmul operands + approx reciprocal -> slightly looser tolerance vs f32 ref.
    np.testing.assert_allclose(np.asarray(y), np.asarray(y_ref), rtol=2e-2, atol=2e-2)

    print("KERNEL_OK")
</pallas_src>

<mosaic_0001>
module attributes {stable_mosaic.version = 11 : i64} {
  func.func @_attention_kernel(%arg0: i32, %arg1: memref<8x32xf32, #tpu.memory_space<vmem>>, %arg2: memref<1x32xf32, #tpu.memory_space<vmem>>, %arg3: memref<1x32xf32, #tpu.memory_space<vmem>>, %arg4: memref<32x192xbf16, #tpu.memory_space<vmem>>, %arg5: memref<64x32xbf16, #tpu.memory_space<vmem>>, %arg6: memref<1x32xf32, #tpu.memory_space<vmem>>, %arg7: memref<8x32xf32, #tpu.memory_space<vmem>>) attributes {dimension_semantics = [#tpu.dimension_semantics<parallel>], iteration_bounds = array<i64: 2>, scalar_prefetch = 0 : i64, scratch_operands = 0 : i64, tpu.core_type = #tpu.core_type<tc>, window_params = [{transform_indices = @transform_0, window_bounds = array<i64: 8, 32>}, {pipeline_mode = #tpu.pipeline_mode<synchronous>, transform_indices = @transform_1, window_bounds = array<i64: 1, 32>}, {pipeline_mode = #tpu.pipeline_mode<synchronous>, transform_indices = @transform_2, window_bounds = array<i64: 1, 32>}, {pipeline_mode = #tpu.pipeline_mode<synchronous>, transform_indices = @transform_3, window_bounds = array<i64: 32, 192>}, {pipeline_mode = #tpu.pipeline_mode<synchronous>, transform_indices = @transform_4, window_bounds = array<i64: 64, 32>}, {pipeline_mode = #tpu.pipeline_mode<synchronous>, transform_indices = @transform_5, window_bounds = array<i64: 1, 32>}, {transform_indices = @transform_6, window_bounds = array<i64: 8, 32>}]} {
    %c0 = arith.constant 0 : index
    %c0_0 = arith.constant 0 : index
    %0 = vector.load %arg1[%c0, %c0_0] : memref<8x32xf32, #tpu.memory_space<vmem>>, vector<8x32xf32>
    %cst = arith.constant dense<0.000000e+00> : vector<8xf32>
    %1 = vector.multi_reduction <add>, %0, %cst [1] : vector<8x32xf32> to vector<8xf32>
    %2 = vector.shape_cast %1 : vector<8xf32> to vector<8x1xf32>
    %cst_1 = arith.constant 3.200000e+01 : f32
    %3 = vector.broadcast %cst_1 : f32 to vector<8x1xf32>
    %4 = arith.divf %2, %3 : vector<8x1xf32>
    %5 = vector.broadcast %4 : vector<8x1xf32> to vector<8x32xf32>
    %6 = arith.subf %0, %5 : vector<8x32xf32>
    %7 = arith.mulf %6, %6 : vector<8x32xf32>
    %cst_2 = arith.constant dense<0.000000e+00> : vector<8xf32>
    %8 = vector.multi_reduction <add>, %7, %cst_2 [1] : vector<8x32xf32> to vector<8xf32>
    %9 = vector.shape_cast %8 : vector<8xf32> to vector<8x1xf32>
    %cst_3 = arith.constant 3.200000e+01 : f32
    %10 = vector.broadcast %cst_3 : f32 to vector<8x1xf32>
    %11 = arith.divf %9, %10 : vector<8x1xf32>
    %12 = vector.broadcast %4 : vector<8x1xf32> to vector<8x32xf32>
    %13 = arith.subf %0, %12 : vector<8x32xf32>
    %cst_4 = arith.constant 9.99999974E-6 : f32
    %14 = vector.broadcast %cst_4 : f32 to vector<8x1xf32>
    %15 = arith.addf %11, %14 : vector<8x1xf32>
    %16 = math.rsqrt %15 : vector<8x1xf32>
    %17 = vector.broadcast %16 : vector<8x1xf32> to vector<8x32xf32>
    %18 = arith.mulf %13, %17 : vector<8x32xf32>
    %c0_5 = arith.constant 0 : index
    %c0_6 = arith.constant 0 : index
    %19 = vector.load %arg2[%c0_5, %c0_6] : memref<1x32xf32, #tpu.memory_space<vmem>>, vector<1x32xf32>
    %20 = vector.broadcast %19 : vector<1x32xf32> to vector<8x32xf32>
    %21 = arith.mulf %18, %20 : vector<8x32xf32>
    %c0_7 = arith.constant 0 : index
    %c0_8 = arith.constant 0 : index
    %22 = vector.load %arg3[%c0_7, %c0_8] : memref<1x32xf32, #tpu.memory_space<vmem>>, vector<1x32xf32>
    %23 = vector.broadcast %22 : vector<1x32xf32> to vector<8x32xf32>
    %24 = arith.addf %21, %23 : vector<8x32xf32>
    %25 = arith.truncf %24 : vector<8x32xf32> to vector<8x32xbf16>
    %c0_9 = arith.constant 0 : index
    %c0_10 = arith.constant 0 : index
    %26 = vector.load %arg4[%c0_9, %c0_10] : memref<32x192xbf16, #tpu.memory_space<vmem>>, vector<32x192xbf16>
    %cst_11 = arith.constant dense<0.000000e+00> : vector<8x192xf32>
    %27 = tpu.matmul %25, %26, %cst_11 {dimension_numbers = #tpu.dot_dimension_numbers<[1], [0], [0], [1], [0, 0, 1, 1], [], []>} : vector<8x32xbf16>, vector<32x192xbf16>, vector<8x192xf32> -> vector<8x192xf32>
    %28 = vector.shape_cast %27 : vector<8x192xf32> to vector<1x8x192xf32>
    %29 = vector.extract_strided_slice %28 {offsets = [0, 0, 0], sizes = [1, 8, 16], strides = [1, 1, 1]} : vector<1x8x192xf32> to vector<1x8x16xf32>
    %30 = arith.truncf %29 : vector<1x8x16xf32> to vector<1x8x16xbf16>
    %31 = vector.extract_strided_slice %28 {offsets = [0, 0, 64], sizes = [1, 8, 16], strides = [1, 1, 1]} : vector<1x8x192xf32> to vector<1x8x16xf32>
    %32 = arith.truncf %31 : vector<1x8x16xf32> to vector<1x8x16xbf16>
    %33 = vector.extract_strided_slice %28 {offsets = [0, 0, 128], sizes = [1, 8, 16], strides = [1, 1, 1]} : vector<1x8x192xf32> to vector<1x8x16xf32>
    %34 = arith.truncf %33 : vector<1x8x16xf32> to vector<1x8x16xbf16>
    "tpu.trace_start"() <{level = 10 : i32, message = "bqd,bkd->bqk"}> : () -> ()
    %cst_12 = arith.constant dense<0.000000e+00> : vector<1x8x8xf32>
    %35 = tpu.matmul %30, %32, %cst_12 {dimension_numbers = #tpu.dot_dimension_numbers<[2], [2], [1], [1], [0, 0, 0, 1, 1, 1], [0], [0]>} : vector<1x8x16xbf16>, vector<1x8x16xbf16>, vector<1x8x8xf32> -> vector<1x8x8xf32>
    "tpu.trace_stop"() : () -> ()
    %cst_13 = arith.constant dense<0xFF800000> : vector<1x8xf32>
    %36 = vector.multi_reduction <maximumf>, %35, %cst_13 [2] : vector<1x8x8xf32> to vector<1x8xf32>
    %37 = vector.shape_cast %36 : vector<1x8xf32> to vector<1x8x1xf32>
    %38 = vector.broadcast %37 : vector<1x8x1xf32> to vector<1x8x8xf32>
    %39 = arith.subf %35, %38 : vector<1x8x8xf32>
    %40 = math.exp %39 : vector<1x8x8xf32>
    %cst_14 = arith.constant dense<0.000000e+00> : vector<1x8xf32>
    %41 = vector.multi_reduction <add>, %40, %cst_14 [2] : vector<1x8x8xf32> to vector<1x8xf32>
    %42 = vector.shape_cast %41 : vector<1x8xf32> to vector<1x8x1xf32>
    %43 = arith.truncf %40 : vector<1x8x8xf32> to vector<1x8x8xbf16>
    "tpu.trace_start"() <{level = 10 : i32, message = "bqk,bkd->bqd"}> : () -> ()
    %cst_15 = arith.constant dense<0.000000e+00> : vector<1x8x16xf32>
    %44 = tpu.matmul %43, %34, %cst_15 {dimension_numbers = #tpu.dot_dimension_numbers<[2], [1], [1], [2], [0, 0, 0, 1, 1, 2], [0], [0]>} : vector<1x8x8xbf16>, vector<1x8x16xbf16>, vector<1x8x16xf32> -> vector<1x8x16xf32>
    "tpu.trace_stop"() : () -> ()
    %45 = tpu.reciprocal %42 {approx = true} : vector<1x8x1xf32> -> vector<1x8x1xf32>
    %46 = vector.broadcast %45 : vector<1x8x1xf32> to vector<1x8x16xf32>
    %47 = arith.mulf %44, %46 : vector<1x8x16xf32>
    %48 = vector.extract_strided_slice %28 {offsets = [0, 0, 16], sizes = [1, 8, 16], strides = [1, 1, 1]} : vector<1x8x192xf32> to vector<1x8x16xf32>
    %49 = arith.truncf %48 : vector<1x8x16xf32> to vector<1x8x16xbf16>
    %50 = vector.extract_strided_slice %28 {offsets = [0, 0, 80], sizes = [1, 8, 16], strides = [1, 1, 1]} : vector<1x8x192xf32> to vector<1x8x16xf32>
    %51 = arith.truncf %50 : vector<1x8x16xf32> to vector<1x8x16xbf16>
    %52 = vector.extract_strided_slice %28 {offsets = [0, 0, 144], sizes = [1, 8, 16], strides = [1, 1, 1]} : vector<1x8x192xf32> to vector<1x8x16xf32>
    %53 = arith.truncf %52 : vector<1x8x16xf32> to vector<1x8x16xbf16>
    "tpu.trace_start"() <{level = 10 : i32, message = "bqd,bkd->bqk"}> : () -> ()
    %cst_16 = arith.constant dense<0.000000e+00> : vector<1x8x8xf32>
    %54 = tpu.matmul %49, %51, %cst_16 {dimension_numbers = #tpu.dot_dimension_numbers<[2], [2], [1], [1], [0, 0, 0, 1, 1, 1], [0], [0]>} : vector<1x8x16xbf16>, vector<1x8x16xbf16>, vector<1x8x8xf32> -> vector<1x8x8xf32>
    "tpu.trace_stop"() : () -> ()
    %cst_17 = arith.constant dense<0xFF800000> : vector<1x8xf32>
    %55 = vector.multi_reduction <maximumf>, %54, %cst_17 [2] : vector<1x8x8xf32> to vector<1x8xf32>
    %56 = vector.shape_cast %55 : vector<1x8xf32> to vector<1x8x1xf32>
    %57 = vector.broadcast %56 : vector<1x8x1xf32> to vector<1x8x8xf32>
    %58 = arith.subf %54, %57 : vector<1x8x8xf32>
    %59 = math.exp %58 : vector<1x8x8xf32>
    %cst_18 = arith.constant dense<0.000000e+00> : vector<1x8xf32>
    %60 = vector.multi_reduction <add>, %59, %cst_18 [2] : vector<1x8x8xf32> to vector<1x8xf32>
    %61 = vector.shape_cast %60 : vector<1x8xf32> to vector<1x8x1xf32>
    %62 = arith.truncf %59 : vector<1x8x8xf32> to vector<1x8x8xbf16>
    "tpu.trace_start"() <{level = 10 : i32, message = "bqk,bkd->bqd"}> : () -> ()
    %cst_19 = arith.constant dense<0.000000e+00> : vector<1x8x16xf32>
    %63 = tpu.matmul %62, %53, %cst_19 {dimension_numbers = #tpu.dot_dimension_numbers<[2], [1], [1], [2], [0, 0, 0, 1, 1, 2], [0], [0]>} : vector<1x8x8xbf16>, vector<1x8x16xbf16>, vector<1x8x16xf32> -> vector<1x8x16xf32>
    "tpu.trace_stop"() : () -> ()
    %64 = tpu.reciprocal %61 {approx = true} : vector<1x8x1xf32> -> vector<1x8x1xf32>
    %65 = vector.broadcast %64 : vector<1x8x1xf32> to vector<1x8x16xf32>
    %66 = arith.mulf %63, %65 : vector<1x8x16xf32>
    %67 = vector.extract_strided_slice %28 {offsets = [0, 0, 32], sizes = [1, 8, 16], strides = [1, 1, 1]} : vector<1x8x192xf32> to vector<1x8x16xf32>
    %68 = arith.truncf %67 : vector<1x8x16xf32> to vector<1x8x16xbf16>
    %69 = vector.extract_strided_slice %28 {offsets = [0, 0, 96], sizes = [1, 8, 16], strides = [1, 1, 1]} : vector<1x8x192xf32> to vector<1x8x16xf32>
    %70 = arith.truncf %69 : vector<1x8x16xf32> to vector<1x8x16xbf16>
    %71 = vector.extract_strided_slice %28 {offsets = [0, 0, 160], sizes = [1, 8, 16], strides = [1, 1, 1]} : vector<1x8x192xf32> to vector<1x8x16xf32>
    %72 = arith.truncf %71 : vector<1x8x16xf32> to vector<1x8x16xbf16>
    "tpu.trace_start"() <{level = 10 : i32, message = "bqd,bkd->bqk"}> : () -> ()
    %cst_20 = arith.constant dense<0.000000e+00> : vector<1x8x8xf32>
    %73 = tpu.matmul %68, %70, %cst_20 {dimension_numbers = #tpu.dot_dimension_numbers<[2], [2], [1], [1], [0, 0, 0, 1, 1, 1], [0], [0]>} : vector<1x8x16xbf16>, vector<1x8x16xbf16>, vector<1x8x8xf32> -> vector<1x8x8xf32>
    "tpu.trace_stop"() : () -> ()
    %cst_21 = arith.constant dense<0xFF800000> : vector<1x8xf32>
    %74 = vector.multi_reduction <maximumf>, %73, %cst_21 [2] : vector<1x8x8xf32> to vector<1x8xf32>
    %75 = vector.shape_cast %74 : vector<1x8xf32> to vector<1x8x1xf32>
    %76 = vector.broadcast %75 : vector<1x8x1xf32> to vector<1x8x8xf32>
    %77 = arith.subf %73, %76 : vector<1x8x8xf32>
    %78 = math.exp %77 : vector<1x8x8xf32>
    %cst_22 = arith.constant dense<0.000000e+00> : vector<1x8xf32>
    %79 = vector.multi_reduction <add>, %78, %cst_22 [2] : vector<1x8x8xf32> to vector<1x8xf32>
    %80 = vector.shape_cast %79 : vector<1x8xf32> to vector<1x8x1xf32>
    %81 = arith.truncf %78 : vector<1x8x8xf32> to vector<1x8x8xbf16>
    "tpu.trace_start"() <{level = 10 : i32, message = "bqk,bkd->bqd"}> : () -> ()
    %cst_23 = arith.constant dense<0.000000e+00> : vector<1x8x16xf32>
    %82 = tpu.matmul %81, %72, %cst_23 {dimension_numbers = #tpu.dot_dimension_numbers<[2], [1], [1], [2], [0, 0, 0, 1, 1, 2], [0], [0]>} : vector<1x8x8xbf16>, vector<1x8x16xbf16>, vector<1x8x16xf32> -> vector<1x8x16xf32>
    "tpu.trace_stop"() : () -> ()
    %83 = tpu.reciprocal %80 {approx = true} : vector<1x8x1xf32> -> vector<1x8x1xf32>
    %84 = vector.broadcast %83 : vector<1x8x1xf32> to vector<1x8x16xf32>
    %85 = arith.mulf %82, %84 : vector<1x8x16xf32>
    %86 = vector.extract_strided_slice %28 {offsets = [0, 0, 48], sizes = [1, 8, 16], strides = [1, 1, 1]} : vector<1x8x192xf32> to vector<1x8x16xf32>
    %87 = arith.truncf %86 : vector<1x8x16xf32> to vector<1x8x16xbf16>
    %88 = vector.extract_strided_slice %28 {offsets = [0, 0, 112], sizes = [1, 8, 16], strides = [1, 1, 1]} : vector<1x8x192xf32> to vector<1x8x16xf32>
    %89 = arith.truncf %88 : vector<1x8x16xf32> to vector<1x8x16xbf16>
    %90 = vector.extract_strided_slice %28 {offsets = [0, 0, 176], sizes = [1, 8, 16], strides = [1, 1, 1]} : vector<1x8x192xf32> to vector<1x8x16xf32>
    %91 = arith.truncf %90 : vector<1x8x16xf32> to vector<1x8x16xbf16>
    "tpu.trace_start"() <{level = 10 : i32, message = "bqd,bkd->bqk"}> : () -> ()
    %cst_24 = arith.constant dense<0.000000e+00> : vector<1x8x8xf32>
    %92 = tpu.matmul %87, %89, %cst_24 {dimension_numbers = #tpu.dot_dimension_numbers<[2], [2], [1], [1], [0, 0, 0, 1, 1, 1], [0], [0]>} : vector<1x8x16xbf16>, vector<1x8x16xbf16>, vector<1x8x8xf32> -> vector<1x8x8xf32>
    "tpu.trace_stop"() : () -> ()
    %cst_25 = arith.constant dense<0xFF800000> : vector<1x8xf32>
    %93 = vector.multi_reduction <maximumf>, %92, %cst_25 [2] : vector<1x8x8xf32> to vector<1x8xf32>
    %94 = vector.shape_cast %93 : vector<1x8xf32> to vector<1x8x1xf32>
    %95 = vector.broadcast %94 : vector<1x8x1xf32> to vector<1x8x8xf32>
    %96 = arith.subf %92, %95 : vector<1x8x8xf32>
    %97 = math.exp %96 : vector<1x8x8xf32>
    %cst_26 = arith.constant dense<0.000000e+00> : vector<1x8xf32>
    %98 = vector.multi_reduction <add>, %97, %cst_26 [2] : vector<1x8x8xf32> to vector<1x8xf32>
    %99 = vector.shape_cast %98 : vector<1x8xf32> to vector<1x8x1xf32>
    %100 = arith.truncf %97 : vector<1x8x8xf32> to vector<1x8x8xbf16>
    "tpu.trace_start"() <{level = 10 : i32, message = "bqk,bkd->bqd"}> : () -> ()
    %cst_27 = arith.constant dense<0.000000e+00> : vector<1x8x16xf32>
    %101 = tpu.matmul %100, %91, %cst_27 {dimension_numbers = #tpu.dot_dimension_numbers<[2], [1], [1], [2], [0, 0, 0, 1, 1, 2], [0], [0]>} : vector<1x8x8xbf16>, vector<1x8x16xbf16>, vector<1x8x16xf32> -> vector<1x8x16xf32>
    "tpu.trace_stop"() : () -> ()
    %102 = tpu.reciprocal %99 {approx = true} : vector<1x8x1xf32> -> vector<1x8x1xf32>
    %103 = vector.broadcast %102 : vector<1x8x1xf32> to vector<1x8x16xf32>
    %104 = arith.mulf %101, %103 : vector<1x8x16xf32>
    %105 = tpu.concatenate %47, %66, %85, %104 in 2 : vector<1x8x16xf32>, vector<1x8x16xf32>, vector<1x8x16xf32>, vector<1x8x16xf32> -> vector<1x8x64xf32>
    %106 = vector.shape_cast %105 : vector<1x8x64xf32> to vector<8x64xf32>
    %107 = arith.truncf %106 : vector<8x64xf32> to vector<8x64xbf16>
    %c0_28 = arith.constant 0 : index
    %c0_29 = arith.constant 0 : index
    %108 = vector.load %arg5[%c0_28, %c0_29] : memref<64x32xbf16, #tpu.memory_space<vmem>>, vector<64x32xbf16>
    %cst_30 = arith.constant dense<0.000000e+00> : vector<8x32xf32>
    %109 = tpu.matmul %107, %108, %cst_30 {dimension_numbers = #tpu.dot_dimension_numbers<[1], [0], [0], [1], [0, 0, 1, 1], [], []>} : vector<8x64xbf16>, vector<64x32xbf16>, vector<8x32xf32> -> vector<8x32xf32>
    %c0_31 = arith.constant 0 : index
    %c0_32 = arith.constant 0 : index
    %110 = vector.load %arg6[%c0_31, %c0_32] : memref<1x32xf32, #tpu.memory_space<vmem>>, vector<1x32xf32>
    %111 = vector.broadcast %110 : vector<1x32xf32> to vector<8x32xf32>
    %112 = arith.addf %109, %111 : vector<8x32xf32>
    %c0_33 = arith.constant 0 : index
    %c0_34 = arith.constant 0 : index
    %113 = vector.load %arg7[%c0_33, %c0_34] : memref<8x32xf32, #tpu.memory_space<vmem>>, vector<8x32xf32>
    tpu.vector_store %arg7[%c0_33, %c0_34], %112 {strides = array<i32>} : memref<8x32xf32, #tpu.memory_space<vmem>>, vector<8x32xf32>,
    return
  }
  func.func @transform_0(%arg0: i32) -> (i32, i32) {
    %c0_i32 = arith.constant 0 : i32
    %c0_i32_0 = arith.constant 0 : i32
    return %arg0, %c0_i32 : i32, i32
  }
  func.func @transform_1(%arg0: i32) -> (i32, i32) {
    %c0_i32 = arith.constant 0 : i32
    %c0_i32_0 = arith.constant 0 : i32
    %c0_i32_1 = arith.constant 0 : i32
    return %c0_i32, %c0_i32_0 : i32, i32
  }
  func.func @transform_2(%arg0: i32) -> (i32, i32) {
    %c0_i32 = arith.constant 0 : i32
    %c0_i32_0 = arith.constant 0 : i32
    %c0_i32_1 = arith.constant 0 : i32
    return %c0_i32, %c0_i32_0 : i32, i32
  }
  func.func @transform_3(%arg0: i32) -> (i32, i32) {
    %c0_i32 = arith.constant 0 : i32
    %c0_i32_0 = arith.constant 0 : i32
    %c0_i32_1 = arith.constant 0 : i32
    return %c0_i32, %c0_i32_0 : i32, i32
  }
  func.func @transform_4(%arg0: i32) -> (i32, i32) {
    %c0_i32 = arith.constant 0 : i32
    %c0_i32_0 = arith.constant 0 : i32
    %c0_i32_1 = arith.constant 0 : i32
    return %c0_i32, %c0_i32_0 : i32, i32
  }
  func.func @transform_5(%arg0: i32) -> (i32, i32) {
    %c0_i32 = arith.constant 0 : i32
    %c0_i32_0 = arith.constant 0 : i32
    %c0_i32_1 = arith.constant 0 : i32
    return %c0_i32, %c0_i32_0 : i32, i32
  }
  func.func @transform_6(%arg0: i32) -> (i32, i32) {
    %c0_i32 = arith.constant 0 : i32
    %c0_i32_0 = arith.constant 0 : i32
    return %arg0, %c0_i32 : i32, i32
  }
}

</mosaic_0001>

<bundles_post_ra>
// kernel: tpu_custom_call.1
= control target key start
LH: loop header
LB: loop body
LE: loop exit
PB: predicated region body
PF: predicated region fallthrough
CT: control target
= control target key end

     0   :  { %11 = vsyncpa [#allocation3], 0  ;;  %s1476_s0 = inlined_call_operand.vmem [shape: f32[16,32], index: 0, kind: input, shape index: {}]   ;;  %s1477_s1 = inlined_call_operand.vmem [shape: f32[1,32], index: 1, kind: input, shape index: {}]   ;;  %s1478_s2 = inlined_call_operand.vmem [shape: f32[1,32], index: 2, kind: input, shape index: {}]   ;;  %s1479_s3 = inlined_call_operand.vmem [shape: bf16[32,192], index: 3, kind: input, shape index: {}]   ;;  %s1480_s4 = inlined_call_operand.vmem [shape: bf16[64,32], index: 4, kind: input, shape index: {}]   ;;  %s1481_s5 = inlined_call_operand.vmem [shape: f32[1,32], index: 5, kind: input, shape index: {}]   ;;  %s1482_s6 = inlined_call_operand.hbm [shape: f32[16,32], index: 6, kind: output, shape index: {}]  }
   0x1   :  { %13 = vsyncpa [#allocation3 + $0x1], 0  ;;  %s1265_s21 = smov 0   ;;  %s1267_s22 = smov 0  }
   0x2   :  { %s1269_s23 = smov 0   ;;  %s1271_s24 = smov 0  }
   0x3 LB: > { %s1286_s25 = sadd.s32 4294967295, %s1217_s24   ;;  %s966_s26 = sadd.s32 4294967294, %s1217_s24   ;;  %s1217_s24 = sphi %s1271_s24, %s1488_s24   ;;  %s1213_s23 = sphi %s1269_s23, %s1487_s23   ;;  %s1209_s22 = sphi %s1267_s22, %s1486_s22   ;;  %s1205_s21 = sphi %s1265_s21, %s1485_s21  }
   0x4   : > { %s1290_s27 = sadd.s32 1, %s1217_s24   ;;  %s157_s28 = sadd.s32 1, %s1213_s23 }
   0x5   : > { %s154_s29 = ssub.s32 %s1217_s24, %s1290_s27  ;;  %p167_p0 = scmp.ne.s32.totalorder %s1213_s23, %s1209_s22 }
   0x6   : > { %p155_p1 = scmp.eq.s32.totalorder %s154_s29, 0  ;;  %p168_p2 = scmp.eq.s32.totalorder %s1286_s25, 1 }
   0x7   : > { %p173_p3 = scmp.ne.s32.totalorder %s1209_s22, %s1205_s21  ;;  %p174_p4 = scmp.eq.s32.totalorder %s966_s26, 1 }
   0x8   : > { %s1301_s30 = scalar_select %p155_p1, %s1213_s23, %s157_s28  }
   0x9   : > { %p1303_p5 = por %p168_p2, %p167_p0  ;;  %p1307_p6 = por %p174_p4, %p173_p3 }
   0xa   : > { %p969_p7 = scmp.ge.s32.totalorder %s1217_s24, 1  ;;  %p214_p8 = scmp.lt.s32.totalorder %s1217_s24, 3 }
   0xc   : > { %p215_p9 = pnand %p969_p7, %p214_p8 }
   0xd   : > { %p243_p10 = scmp.lt.s32.totalorder (!%p215_p9), %s1286_s25, 1  ;;  %vm249_vm0 = vcmask (!%p215_p9), 261120   ;;  %v1127_v7 = vld [vmem:[%s1479_s3 + $0x4] ss:$8 sps:$4 sm:$0xff] (!%p215_p9)   ;;  %v1129_v8 = vld [vmem:[%s1479_s3] ss:$8 sps:$4 sm:$0xff] (!%p215_p9)  }
   0xe   : > { %218 = sbr.rel (%p215_p9) target bundleno = 1671 (0x687), region = 44  ;;  %v1130_v9 = vld [vmem:[%s1479_s3 + $0x14] ss:$8 sps:$4 sm:$0xff] (!%p215_p9)   ;;  %308 = vmatprep.subr.bf16.mxu0 (!%p215_p9), %v1127_v7  ;;  %v1219_v10 = vmov (!%p215_p9), 0   ;;  %v1132_v11 = vld [vmem:[%s1479_s3 + $0x10] ss:$8 sps:$4 sm:$0xff] (!%p215_p9)  }
   0xf   : > { %340 = vmatprep.mubr.bf16.mxu0 (!%p215_p9), %v1219_v10  ;;  %309 = vmatpush1.bf16.msra.mxu0 (!%p215_p9), %v1129_v8  ;;  %v972_v16 = vld [vmem:[%s1477_s1] ss:$0 sm:$0xff] (!%p215_p9)  ;;  %v1220_v22 = vmov (!%p215_p9), 0.0   ;;  %vm1221_vm1 = vmmov (!%p215_p9), 0   ;;  %vm415_vm2 = vcmask (!%p215_p9), 1043456   ;;  %s1222_s11 = smov (!%p215_p9), 112  }
  0x10   : > { %310 = vmatprep.subr.bf16.mxu0 (!%p215_p9), %v1130_v9  ;;  %v973_v18 = vld [vmem:[%s1478_s2] ss:$0 sm:$0xff] (!%p215_p9)  ;;  %1018 = vmatprep.subr.bf16.mxu1 (!%p215_p9), %v1220_v22  ;;  %s1223_s12 = smov (!%p215_p9), 64   ;;  %s1225_s14 = smov (!%p215_p9), 32   ;;  %vm354_vm3 = vcmask (!%p215_p9), 130048   ;;  %vm401_vm4 = vcmask (!%p215_p9), 64512  }
  0x11   : > { %1020 = vmatprep.mubr.msk.bf16.mxu1 (!%p215_p9), %vm1221_vm1, %v1220_v22  ;;  %s1226_s15 = smov (!%p215_p9), 96   ;;  %s1227_s16 = smov (!%p215_p9), 16   ;;  %vm806_vm5 = vcmask (!%p215_p9), 392192   ;;  %vm848_vm6 = vcmask (!%p215_p9), 523264  }
  0x12   : > { %s1228_s17 = smov (!%p215_p9), 80   ;;  %s1229_s28 = smov (!%p215_p9), [#allocation2]  }
  0x13   : > { %311 = vmatpush1.bf16.msra.mxu0 (!%p215_p9), %v1132_v11  ;;  %s1159_s29 = sshll.u32 (!%p215_p9), %s1229_s28, 4  ;;  %s1160_s29 = int_to_ptr.vmem [resolvable:$false] %s1159_s29 }
  0x14   : > { %1024 = vmatprep.subr.bf16.mxu0 (!%p215_p9), %v1220_v22 }
  0x15   : > { %s244_s9 = scalar_select %p243_p10, %s1286_s25, 1 }
  0x17   : > { %s971_s10 = sshll.u32 %s244_s9, 3  ;;  %s1161_s9 = scalar_lea.vmem %s1160_s29, 256 }
  0x18   : > { %s246_s13 = scalar_lea.vmem %s1476_s0, %s971_s10 }
  0x19   : > { %v248_v0 = vld [vmem:[%s246_s13] sm:$0xff]  ;;  %s1224_s13 = smov 48  }
  0x1a   : > { %v250_v1 = vsel %vm249_vm0, %v248_v0, 0.0 }
  0x1b   : > { %251 = vadd.xlane.f32.xlu0 %v250_v1 }
  0xa8   : > { %v252_v2 = vpop.xlane.xlu0 %251 }
  0xa9   : > { %v254_v3 = vmul.f32 0.03125, %v252_v2 }
  0xab   : > { %v255_v4 = vsub.f32 %v248_v0, %v254_v3 }
  0xad   : > { %v256_v5 = vmul.f32 %v255_v4, %v255_v4 }
  0xaf   : > { %v257_v6 = vsel %vm249_vm0, %v256_v5, 0.0 }
  0xb0   : > { %258 = vadd.xlane.f32.xlu0 %v257_v6 }
 0x13d   : > { %v259_v12 = vpop.xlane.xlu0 %258 }
 0x13e   : > { %v260_v13 = vmul.f32 0.03125, %v259_v12 }
 0x140   : > { %v261_v14 = vadd.f32 1e-05, %v260_v13 }
 0x142   : > { %1137 = vrsqrt.f32 %v261_v14 }
 0x14c   : > { %v1138_v15 = vpop.eup %1137 }
 0x14d   : > { %v263_v17 = vmul.f32 %v1138_v15, %v255_v4 }
 0x14f   : > { %v271_v19 = vmul.f32 %v972_v16, %v263_v17 }
 0x151   : > { %v279_v20 = vadd.f32 %v973_v18, %v271_v19 }
 0x153   : > { %v280_v21 = vpack.c.bf16 %v279_v20, %v279_v20 }
 0x155   : > { %978 = vmatmul.mubr.msk.bf16.vlgmr.msra.gmra.mrb[0].mxu0 %vm249_vm0, %v280_v21 }
 0x156   : > { %1026 = vmatprep.mubr.msk.bf16.mxu0 %vm1221_vm1, %v1220_v22 }
 0x228   : > { %v342_v23 = vpop.f32.mrb[0].mxu0 }
 0x229   : > { %v349_v24 = vpack.c.bf16 %v342_v23, %v342_v23  ;;  %v344_v25 = vpop.f32.mrb[1].mxu0 }
 0x22a   : > { %v1345_v26 = vpack.c.bf16 %v344_v25, %v344_v25  ;;  %v346_v27 = vpop.f32.mrb[2].mxu0 }
 0x22b   : > { %461 = vrot.lane.b32.xlu0 %v349_v24, %s1222_s11  ;;  %352 = vrot.lane.b32.xlu1 %v349_v24, %s1223_s12  ;;  %v347_v28 = vpop.f32.mrb[3].mxu0 }
 0x22c   : > { %v417_v29 = vsel %vm415_vm2, %v1345_v26, 0 }
 0x22d   : > { %1025 = vmatpush3.bf16.msra.mxu0 %v417_v29  ;;  %v1133_v29 = vld [vmem:[%s1480_s4] sm:$0xff]  }
 0x22e   : > { %1036 = vmatprep.subr.bf16.mxu0 %v1220_v22 }
 0x22f   : > { %463 = vrot.lane.b32.xlu1 %v349_v24, %s1224_s13 }
 0x233   : > { %574 = vrot.lane.b32.xlu1 %v349_v24, %s1225_s14 }
 0x237   : > { %572 = vrot.lane.b32.xlu1 %v349_v24, %s1226_s15 }
 0x23b   : > { %684 = vrot.lane.b32.xlu1 %v349_v24, %s1227_s16 }
 0x23f   : > { %682 = vrot.lane.b32.xlu1 %v349_v24, %s1228_s17 }
 0x29d   : > { %v353_v30 = vpop.permute.xlu1 %352  ;;  %v462_v35 = vpop.permute.xlu0 %461 }
 0x29e   : > { %v359_v31 = vsel %vm354_vm3, %v353_v30, 0 }
 0x29f   : > { %1019 = vmatpush3.bf16.xpose.msra.mxu1 %v359_v31 }
 0x2a0   : > { %1030 = vmatprep.subr.bf16.mxu1 %v1220_v22 }
 0x2a1   : > { %v464_v32 = vpop.permute.xlu1 %463 }
 0x2a2   : > { %v469_v33 = vsel %vm354_vm3, %v464_v32, 0 }
 0x2a5   : > { %v575_v34 = vpop.permute.xlu1 %574 }
 0x2a6   : > { %1021 = vmatmul.mubr.msk.bf16.vlgmr.msra.gmra.mrb[0].mxu1 %vm354_vm3, %v349_v24  ;;  %v580_v37 = vsel %vm354_vm3, %v575_v34, 0 }
 0x2a7   : > { %1031 = vmatpush3.bf16.xpose.msra.mxu1 %v469_v33  ;;  %1032 = vmatprep.mubr.msk.bf16.mxu1 %vm1221_vm1, %v1220_v22 }
 0x2a8   : > { %1042 = vmatprep.subr.bf16.mxu1 %v1220_v22 }
 0x2a9   : > { %v573_v36 = vpop.permute.xlu1 %572 }
 0x2ad   : > { %v685_v38 = vpop.permute.xlu1 %684 }
 0x2ae   : > { %1033 = vmatmul.mubr.msk.bf16.vlgmr.msra.gmra.mrb[4].mxu1 %vm354_vm3, %v462_v35  ;;  %v690_v39 = vsel %vm354_vm3, %v685_v38, 0 }
 0x2af   : > { %1043 = vmatpush3.bf16.xpose.msra.mxu1 %v580_v37  ;;  %1044 = vmatprep.mubr.msk.bf16.mxu1 %vm1221_vm1, %v1220_v22 }
 0x2b0   : > { %1054 = vmatprep.subr.bf16.mxu1 %v1220_v22 }
 0x2b1   : > { %v683_v40 = vpop.permute.xlu1 %682 }
 0x2b6   : > { %1045 = vmatmul.mubr.msk.bf16.vlgmr.msra.gmra.mrb[8].mxu1 %vm354_vm3, %v573_v36 }
 0x2b7   : > { %1055 = vmatpush3.bf16.xpose.msra.mxu1 %v690_v39  ;;  %1056 = vmatprep.mubr.msk.bf16.mxu1 %vm1221_vm1, %v1220_v22 }
 0x2b8   : > { %1066 = vmatprep.subr.bf16.mxu1 %v1220_v22 }
 0x2be   : > { %1057 = vmatmul.mubr.msk.bf16.vlgmr.msra.gmra.mrb[12].mxu1 %vm354_vm3, %v683_v40 }
 0x2bf   : > { %1074 = vmatprep.mubr.msk.bf16.mxu1 %vm1221_vm1, %v1220_v22  ;;  %1067 = vmatpush3.bf16.msra.mxu1 %v1133_v29 }
 0x2c0   : > { %1068 = vmatprep.subr.bf16.mxu1 %v1220_v22 }
 0x379   : > { %v395_v41 = vpop.f32.mrb[0].mxu1 }
 0x37a   : > { %v1022_v42 = vpop.f32.mrb[1].mxu1  ;;  %v402_v43 = vsel %vm401_vm4, %v395_v41, -inf }
 0x37b   : > { %403 = vmax.xlane.f32.xlu1 %v402_v43  ;;  %v398_v44 = vpop.f32.mrb[2].mxu1  ;;  %v1135_v42 = vld [vmem:[%s1480_s4 + $0x10] sm:$0xff]  }
 0x37c   : > { %v1023_v45 = vpop.f32.mrb[3].mxu1  ;;  %v1136_v44 = vld [vmem:[%s1480_s4 + $0x18] sm:$0xff]  }
 0x381   : > { %v505_v46 = vpop.f32.mrb[4].mxu1 }
 0x382   : > { %v1034_v47 = vpop.f32.mrb[5].mxu1  ;;  %v511_v48 = vsel %vm401_vm4, %v505_v46, -inf }
 0x383   : > { %512 = vmax.xlane.f32.xlu0 %v511_v48  ;;  %v508_v49 = vpop.f32.mrb[6].mxu1 }
 0x384   : > { %v1035_v50 = vpop.f32.mrb[7].mxu1 }
 0x389   : > { %v616_v51 = vpop.f32.mrb[8].mxu1 }
 0x38a   : > { %v1046_v52 = vpop.f32.mrb[9].mxu1  ;;  %v622_v60 = vsel %vm401_vm4, %v616_v51, -inf }
 0x38b   : > { %v619_v53 = vpop.f32.mrb[10].mxu1 }
 0x38c   : > { %v1047_v54 = vpop.f32.mrb[11].mxu1  ;;  %522 = vrot.lane.b32.xlu1 %v1345_v26, %s1222_s11  ;;  %s240_s11 = sand.u32 1, %s1209_s22  }
 0x38d   : > { %s970_s12 = sshll.u32 %s240_s11, 3 }
 0x391   : > { %v726_v55 = vpop.f32.mrb[12].mxu1 }
 0x392   : > { %v1058_v56 = vpop.f32.mrb[13].mxu1  ;;  %v732_v57 = vsel %vm401_vm4, %v726_v55, -inf }
 0x393   : > { %733 = vmax.xlane.f32.xlu0 %v732_v57  ;;  %v729_v58 = vpop.f32.mrb[14].mxu1 }
 0x394   : > { %v1059_v59 = vpop.f32.mrb[15].mxu1 }
 0x3a9   : > { %632 = vrot.lane.b32.xlu0 %v1345_v26, %s1226_s15  ;;  %s994_s15 = sshll.u32 %s1286_s25, 7  ;;  %s894_s25 = scalar_lea.sflag [#allocation3], %s240_s11 }
 0x3aa   : > { %s1433_s20 = scalar_lea.hbm %s1482_s6, %s994_s15 }
 0x3b0   : > { %623 = vmax.xlane.f32.xlu1 %v622_v60 }
 0x3c1   : > { %742 = vrot.lane.b32.xlu1 %v1345_v26, %s1228_s17 }
 0x408   : > { %v404_v61 = vpop.xlane.xlu1 %403 }
 0x409   : > { %v405_v62 = vsub.f32 %v395_v41, %v404_v61  ;;  %v1134_v41 = vld [vmem:[%s1480_s4 + $0x8] sm:$0xff]  }
 0x40a   : > { %1069 = vmatpush3.bf16.msra.mxu1 %v1134_v41 }
 0x40b   : > { %v406_v63 = vmul.f32 1.442695, %v405_v62  ;;  %1070 = vmatprep.subr.bf16.mxu1 %v1220_v22 }
 0x40c   : > { %v523_v4 = vpop.permute.xlu1 %522 }
 0x40d   : > { %1139 = vpow2.f32 %v406_v63  ;;  %v528_v6 = vsel %vm415_vm2, %v523_v4, 0 }
 0x40e   : > { %1071 = vmatpush3.bf16.msra.mxu1 %v1135_v42 }
 0x40f   : > { %1072 = vmatprep.subr.bf16.mxu1 %v1220_v22 }
 0x410   : > { %v513_v0 = vpop.xlane.xlu0 %512 }
 0x411   : > { %v514_v1 = vsub.f32 %v505_v46, %v513_v0 }
 0x412   : > { %1073 = vmatpush3.bf16.msra.mxu1 %v1136_v44 }
 0x413   : > { %v515_v2 = vmul.f32 1.442695, %v514_v1 }
 0x415   : > { %1141 = vpow2.f32 %v515_v2  ;;  %v987_v2 = vld [vmem:[%s1481_s5] ss:$0 sm:$0xff] }
 0x417   : > { %v1140_v3 = vpop.eup %1139 }
 0x418   : > { %v411_v5 = vpack.c.bf16 %v1140_v3, %v1140_v3  ;;  %v408_v12 = vsel %vm401_vm4, %v1140_v3, 0.0 }
 0x41a   : > { %1027 = vmatmul.mubr.msk.bf16.vlgmr.msra.gmra.mrb[4].mxu0 %vm401_vm4, %v411_v5 }
 0x41b   : > { %1037 = vmatpush3.bf16.msra.mxu0 %v528_v6  ;;  %1038 = vmatprep.mubr.msk.bf16.mxu0 %vm1221_vm1, %v1220_v22 }
 0x41c   : > { %1048 = vmatprep.subr.bf16.mxu0 %v1220_v22 }
 0x41f   : > { %v1142_v7 = vpop.eup %1141 }
 0x420   : > { %v734_v8 = vpop.xlane.xlu0 %733  ;;  %v517_v9 = vsel %vm401_vm4, %v1142_v7, 0.0  ;;  %v520_v10 = vpack.c.bf16 %v1142_v7, %v1142_v7 }
 0x421   : > { %518 = vadd.xlane.f32.xlu1 %v517_v9  ;;  %v735_v14 = vsub.f32 %v726_v55, %v734_v8 }
 0x422   : > { %1039 = vmatmul.mubr.msk.bf16.vlgmr.msra.gmra.mrb[8].mxu0 %vm401_vm4, %v520_v10 }
 0x423   : > { %1050 = vmatprep.mubr.msk.bf16.mxu0 %vm1221_vm1, %v1220_v22  ;;  %v736_v17 = vmul.f32 1.442695, %v735_v14 }
 0x424   : > { %v633_v11 = vpop.permute.xlu0 %632 }
 0x425   : > { %v638_v13 = vsel %vm415_vm2, %v633_v11, 0  ;;  %409 = vadd.xlane.f32.xlu1 %v408_v12 }
 0x426   : > { %1049 = vmatpush3.bf16.msra.mxu0 %v638_v13 }
 0x427   : > { %1060 = vmatprep.subr.bf16.mxu0 %v1220_v22 }
 0x43d   : > { %v624_v15 = vpop.xlane.xlu1 %623 }
 0x43e   : > { %v625_v16 = vsub.f32 %v616_v51, %v624_v15 }
 0x440   : > { %v626_v18 = vmul.f32 1.442695, %v625_v16 }
 0x441   : > { %v743_v20 = vpop.permute.xlu1 %742 }
 0x442   : > { %1143 = vpow2.f32 %v626_v18  ;;  %v748_v25 = vsel %vm415_vm2, %v743_v20, 0 }
 0x443   : > { %1145 = vpow2.f32 %v736_v17 }
 0x44c   : > { %v1144_v19 = vpop.eup %1143 }
 0x44d   : > { %v628_v21 = vsel %vm401_vm4, %v1144_v19, 0.0  ;;  %v631_v23 = vpack.c.bf16 %v1144_v19, %v1144_v19  ;;  %v1146_v24 = vpop.eup %1145 }
 0x44e   : > { %629 = vadd.xlane.f32.xlu0 %v628_v21  ;;  %v738_v26 = vsel %vm401_vm4, %v1146_v24, 0.0  ;;  %v741_v27 = vpack.c.bf16 %v1146_v24, %v1146_v24 }
 0x44f   : > { %1051 = vmatmul.mubr.msk.bf16.vlgmr.msra.gmra.mrb[12].mxu0 %vm401_vm4, %v631_v23 }
 0x450   : > { %1061 = vmatpush3.bf16.msra.mxu0 %v748_v25  ;;  %1062 = vmatprep.mubr.msk.bf16.mxu0 %vm1221_vm1, %v1220_v22 }
 0x452   : > { %739 = vadd.xlane.f32.xlu0 %v738_v26 }
 0x457   : > { %1063 = vmatmul.mubr.msk.bf16.vlgmr.msra.gmra.mrb[16].mxu0 %vm401_vm4, %v741_v27 }
 0x4ae   : > { %v519_v28 = vpop.xlane.xlu1 %518 }
 0x4af   : > { %1147 = vrcp.f32 %v519_v28 }
 0x4b2   : > { %v410_v56 = vpop.xlane.xlu1 %409 }
 0x4b9   : > { %v1148_v34 = vpop.eup %1147 }
 0x4db   : > { %v630_v40 = vpop.xlane.xlu0 %629 }
 0x4dc   : > { %1149 = vrcp.f32 %v630_v40 }
 0x4df   : > { %v740_v43 = vpop.xlane.xlu0 %739 }
 0x4e0   : > { %1151 = vrcp.f32 %v740_v43 }
 0x4e1   : > { %1153 = vrcp.f32 %v410_v56 }
 0x4e6   : > { %v1150_v45 = vpop.eup %1149 }
 0x4ea   : > { %v1152_v51 = vpop.eup %1151 }
 0x4eb   : > { %v1154_v57 = vpop.eup %1153 }
 0x4ed   : > { %v453_v30 = vpop.f32.mrb[4].mxu0 }
 0x4ee   : > { %v1028_v31 = vpop.f32.mrb[5].mxu0  ;;  %v460_v60 = vmul.f32 %v1154_v57, %v453_v30 }
 0x4ef   : > { %v456_v32 = vpop.f32.mrb[6].mxu0 }
 0x4f0   : > { %v1029_v33 = vpop.f32.mrb[7].mxu0 }
 0x4f5   : > { %v564_v35 = vpop.f32.mrb[8].mxu0 }
 0x4f6   : > { %v571_v36 = vmul.f32 %v1148_v34, %v564_v35  ;;  %v1040_v37 = vpop.f32.mrb[9].mxu0 }
 0x4f7   : > { %v567_v38 = vpop.f32.mrb[10].mxu0 }
 0x4f8   : > { %793 = vrot.lane.b32.xlu0 %v571_v36, %s1227_s16  ;;  %v1041_v39 = vpop.f32.mrb[11].mxu0  ;;  %s242_s16 = scalar_lea.vmem [#allocation2], %s970_s12 }
 0x4f9   : > { %s907_s17 = sshll.u32 %s242_s16, 4  ;;  %s1435_s17 = int_to_ptr.vmem [resolvable:$true] %s907_s17 }
 0x4fa   : > { %s1155_s26 = scalar_lea.vmem %s1435_s17, 128  ;;  %p1162_p0 = scmp.lt.s32.totalorder %s1435_s17, %s1160_s29 }
 0x4fb   : > { %p1156_p11 = scmp.ne.s32.totalorder %s1435_s17, %s1155_s26  ;;  %p1163_p1 = scmp.lt.s32.totalorder %s1161_s9, %s1155_s26 }
 0x4fd   : > { %p1157_p12 = pnand %p1156_p11, %p1303_p5  ;;  %p1164_p2 = por %p1163_p1, %p1162_p0 }
 0x4ff   : > { %p1158_p13 = pneg %p1157_p12 }
 0x501   : > { %p1165_p3 = pnand %p1164_p2, %p1158_p13 }
 0x522   : > { %v674_v46 = vpop.f32.mrb[12].mxu0 }
 0x523   : > { %v681_v47 = vmul.f32 %v1150_v45, %v674_v46  ;;  %v1052_v48 = vpop.f32.mrb[13].mxu0 }
 0x524   : > { %v677_v49 = vpop.f32.mrb[14].mxu0 }
 0x525   : > { %797 = vrot.lane.b32.xlu1 %v681_v47, %s1225_s14  ;;  %v1053_v50 = vpop.f32.mrb[15].mxu0 }
 0x52a   : > { %v784_v52 = vpop.f32.mrb[16].mxu0 }
 0x52b   : > { %v791_v53 = vmul.f32 %v1152_v51, %v784_v52  ;;  %v1064_v54 = vpop.f32.mrb[17].mxu0 }
 0x52c   : > { %v787_v55 = vpop.f32.mrb[18].mxu0 }
 0x52d   : > { %801 = vrot.lane.b32.xlu1 %v791_v53, %s1224_s13  ;;  %v1065_v22 = vpop.f32.mrb[19].mxu0 }
 0x56a   : > { %v794_v58 = vpop.permute.xlu0 %793 }
 0x56b   : > { %v804_v61 = vsel %vm354_vm3, %v460_v60, %v794_v58 }
 0x597   : > { %v798_v59 = vpop.permute.xlu1 %797 }
 0x598   : > { %v805_v62 = vsel %vm249_vm0, %v804_v61, %v798_v59 }
 0x59f   : > { %v802_v63 = vpop.permute.xlu1 %801 }
 0x5a0   : > { %v807_v0 = vsel %vm806_vm5, %v805_v62, %v802_v63 }
 0x5a1   : > { %v808_v1 = vpack.c.bf16 %v807_v0, %v807_v0 }
 0x5a3   : > { %1075 = vmatmul.mubr.msk.bf16.vlgmr.msra.gmra.mrb[16].mxu1 %vm848_vm6, %v808_v1 }
 0x676   : > { %v886_v3 = vpop.f32.mrb[16].mxu1 }
 0x677   : > { %v887_v4 = vadd.f32 %v987_v2, %v886_v3  ;;  %v1076_v5 = vpop.f32.mrb[17].mxu1 }
 0x678   : > { %v889_v6 = vpop.f32.mrb[18].mxu1 }
 0x679   : > { %v1077_v7 = vpop.f32.mrb[19].mxu1  ;;  %892 = vst.msk [vmem:[%s242_s16] sm:$0xff] %vm249_vm0, %v887_v4 }
 0x67a   : > { %1168 = shalt.err (!%p1165_p3)
}
 0x67b   : > { %s1169_s10 = scalar_lea.hbm %s1433_s20, 128  ;;  %s1173_s13 = scalar_lea.hbm %s1482_s6, 256 }
 0x67c   : > { %p1170_p4 = scmp.ne.s32.totalorder %s1433_s20, %s1169_s10  ;;  %p1174_p9 = scmp.lt.u32.totalorder %s1433_s20, %s1482_s6 }
 0x67d   : > { %p1175_p10 = scmp.lt.u32.totalorder %s1173_s13, %s1169_s10  ;;  %p1177_p12 = scmp.lt.u32.totalorder %s1169_s10, %s1433_s20 }
 0x67e   : > { %p1171_p7 = pnand %p1170_p4, %p1303_p5 }
 0x67f   : > { %p1176_p11 = por %p1175_p10, %p1174_p9 }
 0x680   : > { %p1172_p8 = pneg %p1171_p7 }
 0x681   : > { %p1178_p13 = por %p1177_p12, %p1176_p11 }
 0x683   : > { %p1179_p0 = pnand %p1178_p13, %p1172_p8 }
 0x685   : > { %1182 = shalt.err (!%p1179_p0)
}
 0x686   : > { %1078 = dma.vmem_to_hbm [thread:$0]  (%p1303_p5), %s1435_s17, 128, %s1433_s20, %s894_s25  }
 0x687 PF: > { %p1084_p1 = scmp.ge.s32.totalorder %s1217_s24, 2  ;;  %s919_s16 = sand.u32 1, %s1205_s21  }
 0x688   : > { %s920_s18 = scalar_lea.sflag [#allocation3], %s919_s16 }
 0x689   : > { %p1081_p2 = pnand %p1084_p1, %p1307_p6 }
 0x68b   : > { %1200 = dma.done.wait (!%p1081_p2), %s920_s18, 128  }
 0x68c   : > { %1202 = vsyncadd (!%p1081_p2), %s920_s18, 4294967168  ;;  %p16_p3 = scmp.ge.s32.totalorder %s1290_s27, 4   ;;  %s1485_s21 = smov %s1209_s22 }
 0x68d   : > { %s1486_s22 = smov %s1213_s23  ;;  %s1487_s23 = smov %s1301_s30 }
 0x68e   : > { %s1488_s24 = smov %s1290_s27  ;;  %18 = sbr.rel (!%p16_p3) target bundleno = 3 (0x3), region = 79 }
 0x695   :  { %925 = vsyncpa [#allocation3], 1 }
 0x696   :  { %927 = vsyncpa [#allocation3 + $0x1], 1 }

</bundles_post_ra>
